<compile_context>
chip_gen: v7x
topology: tpu7x:2x2x1
jax: 0.10.0
libtpu: 0.0.40
codegen_flags: <defaults>
</compile_context>

<pallas_src>
import jax
import jax.numpy as jnp
from jax import lax
from jax.experimental import pallas as pl
from jax.experimental.pallas import tpu as pltpu


def _round_up(a, m):
    return (a + m - 1) // m * m


def _choose_tile_n(n, cols, itemsize, *, max_tile_n=8192, per_buffer_bytes=2 << 20):
    """Largest N-tile (multiple of 16) with roughly `per_buffer_bytes` of input per buffer."""
    rows_by_budget = max(per_buffer_bytes // max(cols * itemsize, 1), 16)
    tile = int(min(max_tile_n, rows_by_budget, _round_up(max(n, 1), 16)))
    tile -= tile % 16
    return max(tile, 16)


def _segment_max_kernel(off_ref, tfirst_ref, tnseg_ref, x_ref, out_ref):
    """Scalar-prefetch refs (SMEM): off (B+1,), tile_first (T,), tile_nseg (T,).
    x_ref:   (tile_n, c_blk) block of features for (c-block, N-tile) grid point.
    out_ref: (b_pad, c_blk) resident output block, doubles as the accumulator."""
    t = pl.program_id(1)                     # N-tile axis (innermost, "arbitrary")
    tile_n = x_ref.shape[0]

    @pl.when(t == 0)
    def _init():
        out_ref[...] = jnp.full(out_ref.shape, -jnp.inf, dtype=out_ref.dtype)

    x = x_ref[...]                           # native dtype, no f32 upcast
    neg_inf = jnp.array(-jnp.inf, dtype=x.dtype)
    # Global row index of each sublane row of this tile (2-D iota, lane-bcast).
    row = lax.broadcasted_iota(jnp.int32, (tile_n, 1), 0) + t * tile_n

    first = tfirst_ref[t]                    # first overlapping segment
    nseg = tnseg_ref[t]                      # number of overlapping segments

    def body(j, carry):
        b = first + j
        lo = off_ref[b]                      # SMEM scalar loads
        hi = off_ref[b + 1]
        mask = (row >= lo) & (row < hi)      # (tile_n, 1); rows >= N never pass
        seg_max = jnp.max(jnp.where(mask, x, neg_inf), axis=0, keepdims=True)
        cur = out_ref[pl.ds(b, 1), :]
        out_ref[pl.ds(b, 1), :] = jnp.maximum(cur, seg_max)
        return carry

    lax.fori_loop(0, nseg, body, 0)
    # TODO(synk): per-8-row sublane pre-reduction would cut per-segment work ~8x
    # when many small graphs overlap one tile (nseg >> 4); not needed here.


def global_max_pool_pallas(x, batch, num_graphs, *, tile_n=None):
    """Segment max: out[b, c] = max_{i : batch[i] == b} x[i, c].

    Assumes `batch` is sorted and contiguous (PyTorch-Geometric guarantee).
    Empty segments yield -inf rows (same as jax.ops.segment_max on floats).
    Only floating-point features are supported.
    """
    N, C = x.shape
    B = int(num_graphs)
    assert jnp.issubdtype(x.dtype, jnp.floating), "only float features supported"
    itemsize = jnp.dtype(x.dtype).itemsize

    # Channel blocking: two lane-aligned halves when possible so the v7x megacore
    # can shard the "parallel" axis across both TensorCores; otherwise one full-C
    # block (legal: last block dim == full array dim -> no padded copy of x).
    if C >= 256 and C % 256 == 0:
        c_blk, num_c_blocks = C // 2, 2
    else:
        c_blk, num_c_blocks = C, 1

    b_pad = _round_up(max(B, 1), 8)          # sublane-aligned resident output

    # Generation-aware VMEM capacity (v7x: 64 MiB/TC, v5e/v6e: 128 MiB).
    try:
        vmem_cap = int(pltpu.get_tpu_info().vmem_capacity_bytes)
    except Exception:  # be conservative if the query is unavailable
        vmem_cap = 64 << 20

    if tile_n is None:
        tile_n = _choose_tile_n(N, c_blk, itemsize)
    assert tile_n > 0 and tile_n % 16 == 0, "tile_n must be a positive multiple of 16"

    num_tiles = int(pl.cdiv(N, tile_n))      # ragged last tile handled by masking

    batch_i32 = batch.astype(jnp.int32)
    # Segment row offsets: off[b] = first row of graph b, off[B] = N (sorted batch).
    off = jnp.searchsorted(
        batch_i32, jnp.arange(B + 1, dtype=jnp.int32), side="left"
    ).astype(jnp.int32)

    # Per-tile tables: first overlapping segment and number of overlapping segments.
    tile_start = jnp.arange(num_tiles, dtype=jnp.int32) * tile_n
    tile_end = tile_start + tile_n
    tile_first = jnp.searchsorted(off[1:], tile_start, side="right").astype(jnp.int32)
    tile_last_p1 = jnp.searchsorted(off[:B], tile_end, side="left").astype(jnp.int32)
    tile_nseg = jnp.maximum(tile_last_p1 - tile_first, 0).astype(jnp.int32)

    # VMEM budget: double-buffered input tile + resident output block (+ headroom),
    # clamped to the detected capacity so v7x (64 MiB/TC) is never over-asked.
    need = 2 * tile_n * c_blk * itemsize + 2 * b_pad * c_blk * itemsize
    vmem_limit_bytes = int(min(max(need + (4 << 20), 16 << 20),
                               max(vmem_cap - (4 << 20), 16 << 20)))

    grid_spec = pltpu.PrefetchScalarGridSpec(
        num_scalar_prefetch=3,
        grid=(num_c_blocks, num_tiles),
        in_specs=[pl.BlockSpec((tile_n, c_blk),
                               lambda c, t, off_r, tf_r, tn_r: (t, c))],
        out_specs=pl.BlockSpec((b_pad, c_blk),
                               lambda c, t, off_r, tf_r, tn_r: (0, c)),
    )

    cost = pl.CostEstimate(
        flops=int(2 * N * C),
        transcendentals=0,
        bytes_accessed=int(N * C * itemsize + B * C * itemsize
                           + (B + 1 + 2 * num_tiles) * 4),
    )

    out = pl.pallas_call(
        _segment_max_kernel,
        grid_spec=grid_spec,
        out_shape=jax.ShapeDtypeStruct((b_pad, C), x.dtype),
        compiler_params=pltpu.CompilerParams(
            # channel blocks are independent (megacore-shardable on v7x);
            # the N-tile axis carries the resident accumulator -> reduction.
            dimension_semantics=("parallel", "arbitrary"),
            vmem_limit_bytes=vmem_limit_bytes,
        ),
        cost_estimate=cost,
    )(off, tile_first, tile_nseg, x)

    return out[:B, :C]


def global_pooling_forward(x, pos, batch, num_graphs):
    """JAX equivalent of GlobalPooling.forward (glue around the Pallas kernel)."""
    x_out = global_max_pool_pallas(x, batch, num_graphs)
    # pos.new_zeros((B, 3)) and torch.arange(B) are trivial outputs; plain jnp.
    pos_out = jnp.zeros((x_out.shape[0], 3), dtype=pos.dtype)
    batch_out = jnp.arange(x_out.shape[0], dtype=batch.dtype)
    return x_out, pos_out, batch_out


if __name__ == "__main__":
    key = jax.random.PRNGKey(0)
    k1, k2, k3 = jax.random.split(key, 3)

    # Small, module-consistent shapes: N=64 points, C=32 features, B=4 graphs.
    N, C, B = 64, 32, 4
    x = jax.random.normal(k1, (N, C), dtype=jnp.float32)
    pos = jax.random.normal(k2, (N, 3), dtype=jnp.float32)
    # Sorted point-to-graph assignment with UNEVEN segment sizes (PyG-style).
    seg_sizes = [10, 30, 5, 19]
    batch = jnp.concatenate(
        [jnp.full((s,), i, dtype=jnp.int32) for i, s in enumerate(seg_sizes)])

    x_out, pos_out, batch_out = global_pooling_forward(x, pos, batch, B)
    jax.block_until_ready((x_out, pos_out, batch_out))

    # Reference check against pure-JAX segment max.
    ref = jax.ops.segment_max(x, batch, num_segments=B)
    assert x_out.shape == (B, C)
    assert jnp.allclose(x_out, ref), "segment max mismatch"
    assert pos_out.shape == (B, 3) and pos_out.dtype == pos.dtype
    assert jnp.all(pos_out == 0)
    assert batch_out.shape == (B,)
    assert jnp.array_equal(batch_out, jnp.arange(B, dtype=batch.dtype))

    # Multi-tile path: small tiles so segments cross N-tile boundaries (no x copy).
    x_multi = global_max_pool_pallas(x, batch, B, tile_n=16)
    jax.block_until_ready(x_multi)
    assert jnp.allclose(x_multi, ref), "multi-tile segment max mismatch"

    # Ragged final N tile + two channel blocks (parallel axis) + bf16 native-dtype max.
    N2, C2, B2 = 40, 256, 3
    x2 = jax.random.normal(k3, (N2, C2), dtype=jnp.bfloat16)
    seg2 = [7, 21, 12]
    batch2 = jnp.concatenate(
        [jnp.full((s,), i, dtype=jnp.int32) for i, s in enumerate(seg2)])
    out2 = global_max_pool_pallas(x2, batch2, B2, tile_n=16)
    jax.block_until_ready(out2)
    ref2 = jax.ops.segment_max(x2.astype(jnp.float32), batch2, num_segments=B2)
    assert out2.shape == (B2, C2)
    assert jnp.allclose(out2.astype(jnp.float32), ref2), "bf16/ragged segment max mismatch"

    print("KERNEL_OK")
</pallas_src>

<mosaic_0001>
module attributes {stable_mosaic.version = 11 : i64} {
  func.func @_segment_max_kernel(%arg0: i32, %arg1: i32, %arg2: memref<5xi32, #tpu.memory_space<smem>>, %arg3: memref<1xi32, #tpu.memory_space<smem>>, %arg4: memref<1xi32, #tpu.memory_space<smem>>, %arg5: memref<64x32xf32, #tpu.memory_space<vmem>>, %arg6: memref<8x32xf32, #tpu.memory_space<vmem>>) attributes {dimension_semantics = [#tpu.dimension_semantics<parallel>, #tpu.dimension_semantics<arbitrary>], iteration_bounds = array<i64: 1, 1>, scalar_prefetch = 3 : i64, scratch_operands = 0 : i64, tpu.core_type = #tpu.core_type<tc>, window_params = [{transform_indices = @transform_0, window_bounds = array<i64: 64, 32>}, {transform_indices = @transform_1, window_bounds = array<i64: 8, 32>}]} {
    %c0_i32 = arith.constant 0 : i32
    %0 = arith.cmpi eq, %arg1, %c0_i32 : i32
    %1 = arith.extui %0 : i1 to i32
    %c0_i32_0 = arith.constant 0 : i32
    %2 = arith.cmpi ne, %1, %c0_i32_0 : i32
    scf.if %2 {
      %cst_4 = arith.constant 0xFF800000 : f32
      %14 = vector.broadcast %cst_4 : f32 to vector<8x32xf32>
      %c0_5 = arith.constant 0 : index
      %c0_6 = arith.constant 0 : index
      %15 = vector.load %arg6[%c0_5, %c0_6] : memref<8x32xf32, #tpu.memory_space<vmem>>, vector<8x32xf32>
      tpu.vector_store %arg6[%c0_5, %c0_6], %14 {strides = array<i32>} : memref<8x32xf32, #tpu.memory_space<vmem>>, vector<8x32xf32>,
    } else {
    }
    %c0 = arith.constant 0 : index
    %c0_1 = arith.constant 0 : index
    %3 = vector.load %arg5[%c0, %c0_1] : memref<64x32xf32, #tpu.memory_space<vmem>>, vector<64x32xf32>
    %4 = tpu.iota {dimensions = array<i32: 0>} : vector<64x1xi32>
    %c64_i32 = arith.constant 64 : i32
    %5 = arith.muli %arg1, %c64_i32 : i32
    %6 = vector.broadcast %5 : i32 to vector<64x1xi32>
    %7 = arith.addi %4, %6 : vector<64x1xi32>
    %8 = arith.index_cast %arg1 : i32 to index
    %9 = memref.load %arg3[%8] : memref<1xi32, #tpu.memory_space<smem>>
    %10 = arith.index_cast %arg1 : i32 to index
    %11 = memref.load %arg4[%10] : memref<1xi32, #tpu.memory_space<smem>>
    %c0_i32_2 = arith.constant 0 : i32
    %cst = arith.constant 0xFF800000 : f32
    %c0_i32_3 = arith.constant 0 : i32
    %12 = arith.subi %11, %c0_i32_3 : i32
    %13 = arith.addi %c0_i32_3, %12 : i32
    %c1_i32 = arith.constant 1 : i32
    scf.for %arg7 = %c0_i32_3 to %13 step %c1_i32  : i32 {
      %14 = arith.addi %9, %arg7 : i32
      %15 = arith.index_cast %14 : i32 to index
      %16 = memref.load %arg2[%15] : memref<5xi32, #tpu.memory_space<smem>>
      %c1_i32_4 = arith.constant 1 : i32
      %17 = arith.addi %14, %c1_i32_4 : i32
      %18 = arith.index_cast %17 : i32 to index
      %19 = memref.load %arg2[%18] : memref<5xi32, #tpu.memory_space<smem>>
      %20 = vector.broadcast %16 : i32 to vector<64x1xi32>
      %21 = arith.cmpi sge, %7, %20 : vector<64x1xi32>
      %22 = vector.broadcast %19 : i32 to vector<64x1xi32>
      %23 = arith.cmpi slt, %7, %22 : vector<64x1xi32>
      %24 = arith.andi %21, %23 : vector<64x1xi1>
      %25 = vector.shape_cast %24 : vector<64x1xi1> to vector<64x1xi1>
      %26 = vector.broadcast %25 : vector<64x1xi1> to vector<64x32xi1>
      %27 = vector.broadcast %cst : f32 to vector<64x32xf32>
      %28 = arith.select %26, %3, %27 : vector<64x32xi1>, vector<64x32xf32>
      %cst_5 = arith.constant dense<0xFF800000> : vector<32xf32>
      %29 = vector.multi_reduction <maximumf>, %28, %cst_5 [0] : vector<64x32xf32> to vector<32xf32>
      %30 = vector.shape_cast %29 : vector<32xf32> to vector<1x32xf32>
      %31 = arith.index_cast %14 : i32 to index
      %c0_6 = arith.constant 0 : index
      %32 = vector.load %arg6[%31, %c0_6] : memref<8x32xf32, #tpu.memory_space<vmem>>, vector<1x32xf32>
      %33 = arith.maximumf %32, %30 : vector<1x32xf32>
      %34 = arith.index_cast %14 : i32 to index
      %c0_7 = arith.constant 0 : index
      %35 = vector.load %arg6[%34, %c0_7] : memref<8x32xf32, #tpu.memory_space<vmem>>, vector<1x32xf32>
      tpu.vector_store %arg6[%34, %c0_7], %33 {strides = array<i32>} : memref<8x32xf32, #tpu.memory_space<vmem>>, vector<1x32xf32>,
    }
    return
  }
  func.func @transform_0(%arg0: i32, %arg1: i32, %arg2: memref<5xi32, #tpu.memory_space<smem>>, %arg3: memref<1xi32, #tpu.memory_space<smem>>, %arg4: memref<1xi32, #tpu.memory_space<smem>>) -> (i32, i32) {
    %c0_i32 = arith.constant 0 : i32
    return %arg1, %arg0 : i32, i32
  }
  func.func @transform_1(%arg0: i32, %arg1: i32, %arg2: memref<5xi32, #tpu.memory_space<smem>>, %arg3: memref<1xi32, #tpu.memory_space<smem>>, %arg4: memref<1xi32, #tpu.memory_space<smem>>) -> (i32, i32) {
    %c0_i32 = arith.constant 0 : i32
    %c0_i32_0 = arith.constant 0 : i32
    return %c0_i32, %arg0 : i32, i32
  }
}

</mosaic_0001>

<bundles_post_ra>
// kernel: tpu_custom_call.1
= control target key start
LH: loop header
LB: loop body
LE: loop exit
PB: predicated region body
PF: predicated region fallthrough
CT: control target
= control target key end

     0   :  { %s407_s0 = inlined_call_operand.vmem [shape: s32[5], index: 0, kind: input, shape index: {}]   ;;  %s408_s1 = inlined_call_operand.<no memory space> [shape: s32[1], index: 1, kind: input, shape index: {}]   ;;  %s409_s2 = inlined_call_operand.<no memory space> [shape: s32[1], index: 2, kind: input, shape index: {}]   ;;  %s410_s3 = inlined_call_operand.vmem [shape: f32[64,32], index: 3, kind: input, shape index: {}]   ;;  %s411_s4 = inlined_call_operand.hbm [shape: f32[8,32], index: 4, kind: output, shape index: {}]  }
   0x1   :  { %s9_s17 = sshll.u32 %s407_s0, 4  ;;  %s10_s17 = int_to_ptr.vmem [resolvable:$true] %s9_s17 }
   0x2   :  { %s175_s18 = scalar_lea.vmem %s10_s17, 16  ;;  %p180_p1 = scmp.lt.s32.totalorder %s10_s17, %s10_s17 }
   0x3   :  { %p176_p0 = scmp.ne.s32.totalorder %s10_s17, %s175_s18  ;;  %p181_p2 = scmp.lt.s32.totalorder %s175_s18, %s175_s18 }
   0x5   :  { %p182_p3 = por %p181_p2, %p180_p1 }
   0x7   :  { %p183_p4 = pnand %p182_p3, %p176_p0 }
   0x9   :  { %186 = shalt.err (!%p183_p4)  }
   0xa   :  { %s221_s19 = smov [#allocation3]  }
   0xb   :  { %12 = dma.vmem_to_smem %s10_s17, 16, %s221_s19, [#allocation2] }
   0xc   :  { %213 = dma.done.wait [#allocation2], 16 }
   0xd   :  { %214 = vsyncadd [#allocation2], 4294967280 }
   0xe   :  { %16 = sfence }
   0xf   :  { %17 = vsyncpa [#allocation7], 0  ;;  %vm24_vm0 = vcmask 261120   ;;  %v255_v0 = vld [vmem:[%s410_s3] sm:$0xff]  ;;  %v260_v1 = vld [vmem:[%s410_s3 + $0x8] sm:$0xff]  ;;  %v34_v2 = vlaneseq  ;;  %v222_v3 = vmov -inf  }
  0x10   :  { %25 = vst.msk [vmem:[#allocation6] sm:$0xff] %vm24_vm0, %v222_v3  ;;  %v266_v4 = vld [vmem:[%s410_s3 + $0x10] sm:$0xff]  ;;  %v271_v5 = vld [vmem:[%s410_s3 + $0x18] sm:$0xff]  ;;  %v276_v6 = vld [vmem:[%s410_s3 + $0x20] sm:$0xff]  ;;  %p163_p5 = scmp.le.s32.totalorder %s409_s2, 0 }
  0x11   :  { %v281_v7 = vld [vmem:[%s410_s3 + $0x28] sm:$0xff]  ;;  %v286_v8 = vld [vmem:[%s410_s3 + $0x30] sm:$0xff]  ;;  %v291_v9 = vld [vmem:[%s410_s3 + $0x38] sm:$0xff]  ;;  %v293_v10 = vshrl.u32 %v34_v2, 7  ;;  %s319_s10 = smov (!%p163_p5), 0  }
  0x12   :  { %160 = sbr.rel (%p163_p5) target bundleno = 66 (0x42), region = 30 }
  0x13   :  { %v296_v11 = vadd.s32 8, %v293_v10  ;;  %v299_v12 = vadd.s32 16, %v293_v10  ;;  %v302_v13 = vadd.s32 24, %v293_v10  ;;  %v305_v14 = vadd.s32 32, %v293_v10 }
  0x14   :  { %v308_v15 = vadd.s32 40, %v293_v10  ;;  %v311_v16 = vadd.s32 48, %v293_v10  ;;  %v314_v17 = vadd.s32 56, %v293_v10 }
  0x19 LB: > { %s328_s13 = sadd.s32 %s219_s10, %s408_s1  ;;  %s58_s10 = sadd.s32 1, %s219_s10   ;;  %s219_s10 = sphi %s319_s10, %s58_s10  }
  0x1a   : > { %s62_s14 = sld [smem:[#allocation3 + %s328_s13]]  ;;  %s63_s15 = sadd.s32 1, %s328_s13 }
  0x1b   : > { %s64_s16 = sld [smem:[#allocation3 + %s63_s15]]  ;;  %s137_s17 = scalar_lea.vmem [#allocation6], %s328_s13 }
  0x1c   : > { %v138_v52 = vld [vmem:[%s137_s17] sm:$0x1]  ;;  %p57_p6 = scmp.ge.s32.totalorder %s58_s10, %s409_s2 }
  0x20   : > { %v65_v18 = vstv %s62_s14 }
  0x21   : > { %vm66_vm1 = vcmp.ge.s32.totalorder %v293_v10, %v65_v18  ;;  %vm67_vm2 = vcmp.ge.s32.totalorder %v296_v11, %v65_v18  ;;  %v74_v19 = vstv %s64_s16  ;;  %vm68_vm3 = vcmp.ge.s32.totalorder %v299_v12, %v65_v18 }
  0x22   : > { %vm75_vm4 = vcmp.lt.s32.totalorder %v293_v10, %v74_v19  ;;  %vm76_vm5 = vcmp.lt.s32.totalorder %v296_v11, %v74_v19  ;;  %vm77_vm6 = vcmp.lt.s32.totalorder %v299_v12, %v74_v19  ;;  %vm69_vm7 = vcmp.ge.s32.totalorder %v302_v13, %v65_v18 }
  0x23   : > { %vm78_vm8 = vcmp.lt.s32.totalorder %v302_v13, %v74_v19  ;;  %vm340_vm9 = vmand %vm66_vm1, %vm75_vm4  ;;  %vm70_vm10 = vcmp.ge.s32.totalorder %v305_v14, %v65_v18  ;;  %vm79_vm11 = vcmp.lt.s32.totalorder %v305_v14, %v74_v19  ;;  %vm71_vm13 = vcmp.ge.s32.totalorder %v308_v15, %v65_v18 }
  0x24   : > { %vm346_vm12 = vmand %vm67_vm2, %vm76_vm5  ;;  %v107_v22 = vsel %vm340_vm9, %v255_v0, -inf  ;;  %vm80_vm14 = vcmp.lt.s32.totalorder %v308_v15, %v74_v19  ;;  %vm72_vm1 = vcmp.ge.s32.totalorder %v311_v16, %v65_v18  ;;  %vm81_vm2 = vcmp.lt.s32.totalorder %v311_v16, %v74_v19 }
  0x25   : > { %vm355_vm15 = vmand %vm68_vm3, %vm77_vm6  ;;  %v108_v24 = vsel %vm346_vm12, %v260_v1, -inf  ;;  %vm73_vm3 = vcmp.ge.s32.totalorder %v314_v17, %v65_v18  ;;  %vm82_vm5 = vcmp.lt.s32.totalorder %v314_v17, %v74_v19  ;;  %v116_v28 = vsel %vm24_vm0, %v107_v22, -inf }
  0x26   : > { %vm364_vm4 = vmand %vm69_vm7, %vm78_vm8  ;;  %v109_v26 = vsel %vm355_vm15, %v266_v4, -inf  ;;  %v117_v30 = vsel %vm24_vm0, %v108_v24, -inf }
  0x27   : > { %vm87_vm6 = vmand %vm70_vm10, %vm79_vm11  ;;  %v110_v27 = vsel %vm364_vm4, %v271_v5, -inf  ;;  %v118_v32 = vsel %vm24_vm0, %v109_v26, -inf  ;;  %vm140_vm10 = vcmask 253952  }
  0x28   : > { %vm88_vm9 = vmand %vm71_vm13, %vm80_vm14  ;;  %v111_v29 = vsel %vm87_vm6, %v276_v6, -inf  ;;  %v119_v35 = vsel %vm24_vm0, %v110_v27, -inf }
  0x29   : > { %vm89_vm7 = vmand %vm72_vm1, %vm81_vm2  ;;  %v112_v31 = vsel %vm88_vm9, %v281_v7, -inf  ;;  %v120_v33 = vsel %vm24_vm0, %v111_v29, -inf }
  0x2a   : > { %vm90_vm8 = vmand %vm73_vm3, %vm82_vm5  ;;  %v113_v34 = vsel %vm89_vm7, %v286_v8, -inf  ;;  %v121_v36 = vmax.f32 %v116_v28, %v120_v33  ;;  %v122_v37 = vsel %vm24_vm0, %v112_v31, -inf }
  0x2b   : > { %v114_v38 = vsel %vm90_vm8, %v291_v9, -inf  ;;  %v123_v39 = vmax.f32 %v117_v30, %v122_v37  ;;  %v124_v40 = vsel %vm24_vm0, %v113_v34, -inf }
  0x2c   : > { %v125_v41 = vmax.f32 %v118_v32, %v124_v40  ;;  %v126_v42 = vsel %vm24_vm0, %v114_v38, -inf }
  0x2d   : > { %v127_v43 = vmax.f32 %v119_v35, %v126_v42  ;;  %v128_v44 = vmax.f32 %v121_v36, %v123_v39 }
  0x2f   : > { %v129_v45 = vmax.f32 %v125_v41, %v127_v43 }
  0x31   : > { %v130_v46 = vmax.f32 %v128_v44, %v129_v45 }
  0x33   : > { %v131_v47 = vrot.slane %v130_v46, 4 }
  0x35   : > { %v132_v48 = vmax.f32 %v130_v46, %v131_v47 }
  0x37   : > { %v133_v49 = vrot.slane %v132_v48, 2 }
  0x39   : > { %v134_v50 = vmax.f32 %v132_v48, %v133_v49 }
  0x3b   : > { %v135_v51 = vrot.slane %v134_v50, 1  ;;  %60 = sbr.rel (!%p57_p6) target bundleno = 25 (0x19), region = 36 }
  0x3d   : > { %v136_v53 = vmax.f32 %v134_v50, %v135_v51 }
  0x3f   : > { %v139_v54 = vmax.f32 %v138_v52, %v136_v53 }
  0x41   : > { %141 = vst.msk [vmem:[%s137_s17] sm:$0x1] %vm140_vm10, %v139_v54 }
  0x42 PF:  { %s223_s20 = smov [#allocation6]  }
  0x43   :  { %s148_s21 = sshll.u32 %s223_s20, 4  ;;  %s149_s21 = int_to_ptr.vmem [resolvable:$true] %s148_s21 }
  0x44   :  { %s187_s0 = scalar_lea.vmem %s149_s21, 128  ;;  %p192_p8 = scmp.lt.s32.totalorder %s149_s21, %s149_s21 }
  0x45   :  { %p188_p7 = scmp.ne.s32.totalorder %s149_s21, %s187_s0  ;;  %p193_p9 = scmp.lt.s32.totalorder %s187_s0, %s187_s0 }
  0x47   :  { %p194_p10 = por %p193_p9, %p192_p8 }
  0x49   :  { %p195_p11 = pnand %p194_p10, %p188_p7 }
  0x4b   :  { %198 = shalt.err (!%p195_p11)
}
  0x4c   :  { %s199_s24 = scalar_lea.hbm %s411_s4, 128 }
  0x4d   :  { %p200_p12 = scmp.ne.s32.totalorder %s411_s4, %s199_s24  ;;  %p203_p13 = scmp.lt.u32.totalorder %s199_s24, %s411_s4 }
  0x4f   :  { %p205_p0 = pnand %p203_p13, %p200_p12 }
  0x51   :  { %208 = shalt.err (!%p205_p0)
}
  0x52   :  { %151 = dma.vmem_to_hbm [thread:$0]  %s149_s21, 128, %s411_s4, [#allocation7]  }
  0x53   :  { %215 = dma.done.wait [#allocation7], 128  }
  0x54   :  { %216 = vsyncadd [#allocation7], 4294967168 }
  0x55   :  { %155 = vsyncpa [#allocation7], 1 }

</bundles_post_ra>
